<compile_context>
chip_gen: v6e
topology: v6e:2x2x1
jax: 0.10.0
libtpu: 0.0.40
codegen_flags: <defaults>
</compile_context>

<pallas_src>
import functools

import jax
import jax.numpy as jnp
from jax.experimental import pallas as pl
from jax.experimental.pallas import tpu as pltpu

KGE_SIZE = 32
LN_EPS = 1e-5  # torch.nn.LayerNorm default
_HI = jax.lax.Precision.HIGHEST


def _round_up(v, m):
    return (v + m - 1) // m * m


def _disc_dw_kernel(x_ref, kge_ref, w_eff_ref, w0b_ref, b0_ref,
                    w1_ref, b1_ref, out_ref):
    # x:     (TB, L)      kge:   (TB, KGE)
    # w_eff: (L, H)       w0b:   (KGE, H)     b0: (1, H)
    # w1:    (1, H)  (gamma folded in)        b1: (1, 1)  (beta folded in)
    x = x_ref[...]
    kge = kge_ref[...]

    # Linear0 with the pattern projection pre-folded into w_eff.
    h = (jnp.dot(x, w_eff_ref[...],
                 preferred_element_type=jnp.float32, precision=_HI)
         + jnp.dot(kge, w0b_ref[...],
                   preferred_element_type=jnp.float32, precision=_HI)
         + b0_ref[...])                                              # (TB, H)

    # LayerNorm (biased variance, matching torch.nn.LayerNorm); affine folded
    # into w1/b1 in the wrapper.
    mu = jnp.mean(h, axis=-1, keepdims=True)
    var = jnp.mean(jnp.square(h - mu), axis=-1, keepdims=True)
    hn = (h - mu) * jax.lax.rsqrt(var + LN_EPS)

    # Linear1 as a VPU multiply + lane-reduce (H=8, N=1 -> no MXU needed).
    z = jnp.sum(hn * w1_ref[...], axis=-1, keepdims=True) + b1_ref[...]  # (TB, 1)
    out_ref[...] = jax.nn.sigmoid(z)


def discriminator_dw_forward(x, kge, params, *, batch_tile=2048):
    """x: (B, pattern_length) f32, kge: (B, KGE_SIZE) f32 -> (B, 1) f32."""
    x = x.astype(jnp.float32)
    kge = kge.astype(jnp.float32)
    B, L = x.shape
    P = params["dwr_patterns"].shape[0]
    H = params["b0"].shape[0]

    # --- wrapper-side algebraic folding (exact in f32 up to reassociation) ---
    # (x @ pat.T) @ W0a.T  ==  x @ (pat.T @ W0a.T)
    pat_t = params["dwr_patterns"].T.astype(jnp.float32)             # (L, P)
    w0_t = params["w0"].T.astype(jnp.float32)                        # (P+KGE, H)
    w_eff = jnp.dot(pat_t, w0_t[:P], precision=_HI)                  # (L, H)
    w0b_t = w0_t[P:]                                                 # (KGE, H)
    b0 = params["b0"].reshape(1, H).astype(jnp.float32)

    # (hn*gamma + beta) @ w1.T + b1  ==  hn @ (gamma*w1).T + (beta.w1 + b1)
    gamma = params["ln_gamma"].reshape(1, H).astype(jnp.float32)
    beta = params["ln_beta"].reshape(1, H).astype(jnp.float32)
    w1 = params["w1"].reshape(1, H).astype(jnp.float32)
    w1_eff = gamma * w1                                              # (1, H)
    b1_eff = (jnp.sum(beta * w1) + params["b1"].reshape(())).reshape(1, 1)

    # --- batch tiling ---
    TB = min(_round_up(max(B, 1), 8), batch_tile)
    Bp = _round_up(B, TB)
    if Bp != B:
        x = jnp.pad(x, ((0, Bp - B), (0, 0)))
        kge = jnp.pad(kge, ((0, Bp - B), (0, 0)))
    grid = (Bp // TB,)

    batch_map = lambda i: (i, 0)
    const_map = lambda i: (0, 0)
    in_specs = [
        pl.BlockSpec((TB, L), batch_map),          # x
        pl.BlockSpec((TB, KGE_SIZE), batch_map),   # kge
        pl.BlockSpec((L, H), const_map),           # w_eff
        pl.BlockSpec((KGE_SIZE, H), const_map),    # w0b_t
        pl.BlockSpec((1, H), const_map),           # b0
        pl.BlockSpec((1, H), const_map),           # w1_eff
        pl.BlockSpec((1, 1), const_map),           # b1_eff
    ]
    out_specs = pl.BlockSpec((TB, 1), batch_map)

    weight_bytes = 4 * (L * H + KGE_SIZE * H + 3 * H + 1)
    cost = pl.CostEstimate(
        flops=2 * Bp * (L * H + KGE_SIZE * H + H),
        transcendentals=2 * Bp,                    # rsqrt + sigmoid per row
        bytes_accessed=Bp * (L + KGE_SIZE + 1) * 4 + weight_bytes,
    )

    out = pl.pallas_call(
        _disc_dw_kernel,
        out_shape=jax.ShapeDtypeStruct((Bp, 1), jnp.float32),
        grid=grid,
        in_specs=in_specs,
        out_specs=out_specs,
        compiler_params=pltpu.CompilerParams(
            dimension_semantics=("parallel",)),
        cost_estimate=cost,
    )(x, kge, w_eff, w0b_t, b0, w1_eff, b1_eff)

    return out[:B]


def init_params(key, pattern_num=32, pattern_length=168, hidden_size=8):
    """Deterministic synthetic init matching the PyTorch module's shapes."""
    k0, k1, k2, k3, k4 = jax.random.split(key, 5)

    # nn.init.orthogonal_(dwr_patterns): rows orthonormal (pattern_num <= pattern_length)
    a = jax.random.normal(k0, (pattern_length, pattern_num), jnp.float32)
    q, r = jnp.linalg.qr(a)                               # q: (L, P), orthonormal cols
    q = q * jnp.sign(jnp.diag(r))[None, :]
    dwr_patterns = q.T                                    # (P, L)

    in0 = pattern_num + KGE_SIZE
    lim0 = 1.0 / (in0 ** 0.5)
    w0 = jax.random.uniform(k1, (hidden_size, in0), jnp.float32, -lim0, lim0)
    b0 = jax.random.uniform(k2, (hidden_size,), jnp.float32, -lim0, lim0)

    lim1 = 1.0 / (hidden_size ** 0.5)
    w1 = jax.random.uniform(k3, (1, hidden_size), jnp.float32, -lim1, lim1)
    b1 = jax.random.uniform(k4, (1,), jnp.float32, -lim1, lim1)

    return dict(
        dwr_patterns=dwr_patterns,
        w0=w0, b0=b0,
        ln_gamma=jnp.ones((hidden_size,), jnp.float32),
        ln_beta=jnp.zeros((hidden_size,), jnp.float32),
        w1=w1, b1=b1,
    )


def _reference_forward(x, kge, params):
    """Pure-JAX reference replicating the PyTorch forward exactly (f32)."""
    x_p = jnp.dot(x, params["dwr_patterns"].T, precision=_HI)
    cat = jnp.concatenate([x_p, kge], axis=1)
    h = jnp.dot(cat, params["w0"].T, precision=_HI) + params["b0"]
    mu = jnp.mean(h, axis=-1, keepdims=True)
    var = jnp.mean(jnp.square(h - mu), axis=-1, keepdims=True)
    hn = (h - mu) / jnp.sqrt(var + LN_EPS)
    hn = hn * params["ln_gamma"] + params["ln_beta"]
    z = jnp.dot(hn, params["w1"].T, precision=_HI) + params["b1"]
    return jax.nn.sigmoid(z)


if __name__ == "__main__":
    PATTERN_NUM = 32
    PATTERN_LENGTH = 168
    HIDDEN = 8
    B = 8

    key = jax.random.PRNGKey(0)
    kp, kx, kk = jax.random.split(key, 3)

    params = init_params(kp, PATTERN_NUM, PATTERN_LENGTH, HIDDEN)
    x = jax.random.normal(kx, (B, PATTERN_LENGTH), jnp.float32)
    kge = jax.random.normal(kk, (B, KGE_SIZE), jnp.float32)

    fwd = jax.jit(functools.partial(discriminator_dw_forward, params=params))
    out = jax.block_until_ready(fwd(x, kge))

    ref = _reference_forward(x, kge, params)
    assert out.shape == (B, 1), out.shape
    # Folding W_eff = pat.T @ W0a.T reassociates the f32 reduction -> tiny ulp drift.
    assert jnp.allclose(out, ref, atol=5e-5, rtol=5e-5), (out, ref)

    # Also exercise a batch size that is not a tile multiple (padding path).
    B2 = 37
    kx2, kk2 = jax.random.split(jax.random.PRNGKey(1))
    x2 = jax.random.normal(kx2, (B2, PATTERN_LENGTH), jnp.float32)
    kge2 = jax.random.normal(kk2, (B2, KGE_SIZE), jnp.float32)
    out2 = jax.block_until_ready(fwd(x2, kge2))
    ref2 = _reference_forward(x2, kge2, params)
    assert out2.shape == (B2, 1), out2.shape
    assert jnp.allclose(out2, ref2, atol=5e-5, rtol=5e-5), (out2, ref2)

    print("KERNEL_OK")
</pallas_src>

<mosaic_0001>
module attributes {stable_mosaic.version = 11 : i64} {
  func.func @_disc_dw_kernel(%arg0: i32, %arg1: memref<8x168xf32, #tpu.memory_space<vmem>>, %arg2: memref<8x32xf32, #tpu.memory_space<vmem>>, %arg3: memref<168x8xf32, #tpu.memory_space<vmem>>, %arg4: memref<32x8xf32, #tpu.memory_space<vmem>>, %arg5: memref<1x8xf32, #tpu.memory_space<vmem>>, %arg6: memref<1x8xf32, #tpu.memory_space<vmem>>, %arg7: memref<1x1xf32, #tpu.memory_space<vmem>>, %arg8: memref<8x1xf32, #tpu.memory_space<vmem>>) attributes {dimension_semantics = [#tpu.dimension_semantics<parallel>], iteration_bounds = array<i64: 1>, scalar_prefetch = 0 : i64, scratch_operands = 0 : i64, tpu.core_type = #tpu.core_type<tc>, window_params = [{transform_indices = @transform_0, window_bounds = array<i64: 8, 168>}, {transform_indices = @transform_1, window_bounds = array<i64: 8, 32>}, {pipeline_mode = #tpu.pipeline_mode<synchronous>, transform_indices = @transform_2, window_bounds = array<i64: 168, 8>}, {pipeline_mode = #tpu.pipeline_mode<synchronous>, transform_indices = @transform_3, window_bounds = array<i64: 32, 8>}, {pipeline_mode = #tpu.pipeline_mode<synchronous>, transform_indices = @transform_4, window_bounds = array<i64: 1, 8>}, {pipeline_mode = #tpu.pipeline_mode<synchronous>, transform_indices = @transform_5, window_bounds = array<i64: 1, 8>}, {pipeline_mode = #tpu.pipeline_mode<synchronous>, transform_indices = @transform_6, window_bounds = array<i64: 1, 1>}, {transform_indices = @transform_7, window_bounds = array<i64: 8, 1>}]} {
    %c0 = arith.constant 0 : index
    %c0_0 = arith.constant 0 : index
    %0 = vector.load %arg1[%c0, %c0_0] : memref<8x168xf32, #tpu.memory_space<vmem>>, vector<8x168xf32>
    %c0_1 = arith.constant 0 : index
    %c0_2 = arith.constant 0 : index
    %1 = vector.load %arg2[%c0_1, %c0_2] : memref<8x32xf32, #tpu.memory_space<vmem>>, vector<8x32xf32>
    %c0_3 = arith.constant 0 : index
    %c0_4 = arith.constant 0 : index
    %2 = vector.load %arg3[%c0_3, %c0_4] : memref<168x8xf32, #tpu.memory_space<vmem>>, vector<168x8xf32>
    %cst = arith.constant dense<0.000000e+00> : vector<8x8xf32>
    %3 = tpu.matmul %0, %2, %cst {dimension_numbers = #tpu.dot_dimension_numbers<[1], [0], [0], [1], [0, 0, 1, 1], [], []>, precision = #tpu.contract_precision<fp32>} : vector<8x168xf32>, vector<168x8xf32>, vector<8x8xf32> -> vector<8x8xf32>
    %c0_5 = arith.constant 0 : index
    %c0_6 = arith.constant 0 : index
    %4 = vector.load %arg4[%c0_5, %c0_6] : memref<32x8xf32, #tpu.memory_space<vmem>>, vector<32x8xf32>
    %cst_7 = arith.constant dense<0.000000e+00> : vector<8x8xf32>
    %5 = tpu.matmul %1, %4, %cst_7 {dimension_numbers = #tpu.dot_dimension_numbers<[1], [0], [0], [1], [0, 0, 1, 1], [], []>, precision = #tpu.contract_precision<fp32>} : vector<8x32xf32>, vector<32x8xf32>, vector<8x8xf32> -> vector<8x8xf32>
    %6 = arith.addf %3, %5 : vector<8x8xf32>
    %c0_8 = arith.constant 0 : index
    %c0_9 = arith.constant 0 : index
    %7 = vector.load %arg5[%c0_8, %c0_9] : memref<1x8xf32, #tpu.memory_space<vmem>>, vector<1x8xf32>
    %8 = vector.broadcast %7 : vector<1x8xf32> to vector<8x8xf32>
    %9 = arith.addf %6, %8 : vector<8x8xf32>
    %cst_10 = arith.constant dense<0.000000e+00> : vector<8xf32>
    %10 = vector.multi_reduction <add>, %9, %cst_10 [1] : vector<8x8xf32> to vector<8xf32>
    %11 = vector.shape_cast %10 : vector<8xf32> to vector<8x1xf32>
    %cst_11 = arith.constant 8.000000e+00 : f32
    %12 = vector.broadcast %cst_11 : f32 to vector<8x1xf32>
    %13 = arith.divf %11, %12 : vector<8x1xf32>
    %14 = vector.broadcast %13 : vector<8x1xf32> to vector<8x8xf32>
    %15 = arith.subf %9, %14 : vector<8x8xf32>
    %16 = arith.mulf %15, %15 : vector<8x8xf32>
    %cst_12 = arith.constant dense<0.000000e+00> : vector<8xf32>
    %17 = vector.multi_reduction <add>, %16, %cst_12 [1] : vector<8x8xf32> to vector<8xf32>
    %18 = vector.shape_cast %17 : vector<8xf32> to vector<8x1xf32>
    %cst_13 = arith.constant 8.000000e+00 : f32
    %19 = vector.broadcast %cst_13 : f32 to vector<8x1xf32>
    %20 = arith.divf %18, %19 : vector<8x1xf32>
    %21 = vector.broadcast %13 : vector<8x1xf32> to vector<8x8xf32>
    %22 = arith.subf %9, %21 : vector<8x8xf32>
    %cst_14 = arith.constant 9.99999974E-6 : f32
    %23 = vector.broadcast %cst_14 : f32 to vector<8x1xf32>
    %24 = arith.addf %20, %23 : vector<8x1xf32>
    %25 = math.rsqrt %24 : vector<8x1xf32>
    %26 = vector.broadcast %25 : vector<8x1xf32> to vector<8x8xf32>
    %27 = arith.mulf %22, %26 : vector<8x8xf32>
    %c0_15 = arith.constant 0 : index
    %c0_16 = arith.constant 0 : index
    %28 = vector.load %arg6[%c0_15, %c0_16] : memref<1x8xf32, #tpu.memory_space<vmem>>, vector<1x8xf32>
    %29 = vector.broadcast %28 : vector<1x8xf32> to vector<8x8xf32>
    %30 = arith.mulf %27, %29 : vector<8x8xf32>
    %cst_17 = arith.constant dense<0.000000e+00> : vector<8xf32>
    %31 = vector.multi_reduction <add>, %30, %cst_17 [1] : vector<8x8xf32> to vector<8xf32>
    %32 = vector.shape_cast %31 : vector<8xf32> to vector<8x1xf32>
    %c0_18 = arith.constant 0 : index
    %c0_19 = arith.constant 0 : index
    %33 = vector.load %arg7[%c0_18, %c0_19] : memref<1x1xf32, #tpu.memory_space<vmem>>, vector<1x1xf32>
    %34 = vector.broadcast %33 : vector<1x1xf32> to vector<8x1xf32>
    %35 = arith.addf %32, %34 : vector<8x1xf32>
    %36 = arith.negf %35 : vector<8x1xf32>
    %37 = math.exp %36 : vector<8x1xf32>
    %cst_20 = arith.constant 1.000000e+00 : f32
    %38 = vector.broadcast %cst_20 : f32 to vector<8x1xf32>
    %39 = arith.addf %38, %37 : vector<8x1xf32>
    %40 = arith.divf %38, %39 : vector<8x1xf32>
    %c0_21 = arith.constant 0 : index
    %c0_22 = arith.constant 0 : index
    %41 = vector.load %arg8[%c0_21, %c0_22] : memref<8x1xf32, #tpu.memory_space<vmem>>, vector<8x1xf32>
    tpu.vector_store %arg8[%c0_21, %c0_22], %40 {strides = array<i32>} : memref<8x1xf32, #tpu.memory_space<vmem>>, vector<8x1xf32>,
    return
  }
  func.func @transform_0(%arg0: i32) -> (i32, i32) {
    %c0_i32 = arith.constant 0 : i32
    %c0_i32_0 = arith.constant 0 : i32
    return %arg0, %c0_i32 : i32, i32
  }
  func.func @transform_1(%arg0: i32) -> (i32, i32) {
    %c0_i32 = arith.constant 0 : i32
    %c0_i32_0 = arith.constant 0 : i32
    return %arg0, %c0_i32 : i32, i32
  }
  func.func @transform_2(%arg0: i32) -> (i32, i32) {
    %c0_i32 = arith.constant 0 : i32
    %c0_i32_0 = arith.constant 0 : i32
    %c0_i32_1 = arith.constant 0 : i32
    return %c0_i32, %c0_i32_0 : i32, i32
  }
  func.func @transform_3(%arg0: i32) -> (i32, i32) {
    %c0_i32 = arith.constant 0 : i32
    %c0_i32_0 = arith.constant 0 : i32
    %c0_i32_1 = arith.constant 0 : i32
    return %c0_i32, %c0_i32_0 : i32, i32
  }
  func.func @transform_4(%arg0: i32) -> (i32, i32) {
    %c0_i32 = arith.constant 0 : i32
    %c0_i32_0 = arith.constant 0 : i32
    %c0_i32_1 = arith.constant 0 : i32
    return %c0_i32, %c0_i32_0 : i32, i32
  }
  func.func @transform_5(%arg0: i32) -> (i32, i32) {
    %c0_i32 = arith.constant 0 : i32
    %c0_i32_0 = arith.constant 0 : i32
    %c0_i32_1 = arith.constant 0 : i32
    return %c0_i32, %c0_i32_0 : i32, i32
  }
  func.func @transform_6(%arg0: i32) -> (i32, i32) {
    %c0_i32 = arith.constant 0 : i32
    %c0_i32_0 = arith.constant 0 : i32
    %c0_i32_1 = arith.constant 0 : i32
    return %c0_i32, %c0_i32_0 : i32, i32
  }
  func.func @transform_7(%arg0: i32) -> (i32, i32) {
    %c0_i32 = arith.constant 0 : i32
    %c0_i32_0 = arith.constant 0 : i32
    return %arg0, %c0_i32 : i32, i32
  }
}

</mosaic_0001>

<bundles_post_ra>
// kernel: discriminator_dw_forward.1
= control target key start
LH: loop header
LB: loop body
LE: loop exit
PB: predicated region body
PF: predicated region fallthrough
CT: control target
= control target key end

     0   :  { %s2208_s0 = inlined_call_operand.hbm [shape: f32[8,168], index: 0, kind: input, shape index: {}]   ;;  %s2209_s1 = inlined_call_operand.hbm [shape: f32[8,32], index: 1, kind: input, shape index: {}]   ;;  %s2210_s2 = inlined_call_operand.hbm [shape: f32[168,8], index: 2, kind: input, shape index: {}]   ;;  %s2211_s3 = inlined_call_operand.hbm [shape: f32[32,8], index: 3, kind: input, shape index: {}]   ;;  %s2212_s4 = inlined_call_operand.vmem [shape: f32[1,8], index: 4, kind: input, shape index: {}]   ;;  %s2213_s5 = inlined_call_operand.vmem [shape: f32[1,8], index: 5, kind: input, shape index: {}]   ;;  %s2214_s6 = inlined_call_operand.<no memory space> [shape: f32[1,1], index: 6, kind: input, shape index: {}]   ;;  %s2215_s7 = inlined_call_operand.vmem [shape: f32[8,1], index: 7, kind: output, shape index: {}]  }
   0x1   :  { %v12_v0 = vstv %s2214_s6 }
   0x2   :  { %13 = vst [vmem:[#allocation2] sm:$0x1] %v12_v0 }
   0x3   :  { %14 = vsyncpa [#allocation4], 0 }
   0x4   :  { %15 = vsyncpa [#allocation6], 0 }
   0x5   :  { %16 = vsyncpa [#allocation9], 0  ;;  %s1576_s26 = smov [#allocation5]   ;;  %s1577_s28 = smov [#allocation3]  }
   0x6   :  { %s33_s27 = sshll.u32 %s1576_s26, 4  ;;  %s23_s29 = sshll.u32 %s1577_s28, 4  ;;  %s34_s27 = int_to_ptr.vmem [resolvable:$true] %s33_s27  ;;  %s24_s29 = int_to_ptr.vmem [resolvable:$true] %s23_s29 }
   0x7   :  { %s1498_s30 = scalar_lea.vmem %s34_s27, 128  ;;  %p1503_p1 = scmp.lt.s32.totalorder %s34_s27, %s34_s27 }
   0x8   :  { %p1499_p0 = scmp.ne.s32.totalorder %s34_s27, %s1498_s30  ;;  %p1504_p2 = scmp.lt.s32.totalorder %s1498_s30, %s1498_s30 }
   0xa   :  { %p1505_p3 = por %p1504_p2, %p1503_p1 }
   0xc   :  { %p1506_p4 = pnand %p1505_p3, %p1499_p0 }
   0xe   :  { %1509 = shalt.err (!%p1506_p4)
}
   0xf   :  { %36 = dma.hbm_to_vmem [thread:$0]  %s2209_s1, 128, %s34_s27, [#allocation6]  }
  0x10   :  { %s1518_s6 = scalar_lea.vmem %s24_s29, 256  ;;  %p1523_p6 = scmp.lt.s32.totalorder %s24_s29, %s24_s29 }
  0x11   :  { %p1519_p5 = scmp.ne.s32.totalorder %s24_s29, %s1518_s6  ;;  %p1524_p7 = scmp.lt.s32.totalorder %s1518_s6, %s1518_s6 }
  0x13   :  { %p1525_p8 = por %p1524_p7, %p1523_p6 }
  0x15   :  { %p1526_p9 = pnand %p1525_p8, %p1519_p5 }
  0x17   :  { %1529 = shalt.err (!%p1526_p9)
}
  0x18   :  { %26 = dma.hbm_to_vmem [thread:$0]  %s2208_s0, 256, %s24_s29, [#allocation4]  }
  0x19   :  { %s1578_s12 = smov [#allocation7]  }
  0x1a   :  { %s42_s13 = sshll.u32 %s1578_s12, 4  ;;  %s43_s13 = int_to_ptr.vmem [resolvable:$true] %s42_s13 }
  0x1b   :  { %s1538_s14 = scalar_lea.vmem %s43_s13, 2688  ;;  %p1543_p11 = scmp.lt.s32.totalorder %s43_s13, %s43_s13 }
  0x1c   :  { %p1539_p10 = scmp.ne.s32.totalorder %s43_s13, %s1538_s14  ;;  %p1544_p12 = scmp.lt.s32.totalorder %s1538_s14, %s1538_s14 }
  0x1e   :  { %p1545_p13 = por %p1544_p12, %p1543_p11 }
  0x20   :  { %p1546_p0 = pnand %p1545_p13, %p1539_p10 }
  0x22   :  { %1549 = shalt.err (!%p1546_p0)
}
  0x23   :  { %s1579_s1 = smov 128   ;;  %s1580_s15 = smov 8  }
  0x24   :  { %48 = dma.hbm_to_vmem [thread:$0]  %s2210_s2, 2688, %s43_s13, [#allocation6], %s1579_s1, %s1579_s1, %s1580_s15  }
  0x25   :  { %s1581_s18 = smov [#allocation8]  }
  0x26   :  { %s54_s19 = sshll.u32 %s1581_s18, 4  ;;  %s55_s19 = int_to_ptr.vmem [resolvable:$true] %s54_s19 }
  0x27   :  { %s1558_s0 = scalar_lea.vmem %s55_s19, 512  ;;  %p1563_p2 = scmp.lt.s32.totalorder %s55_s19, %s55_s19 }
  0x28   :  { %p1559_p1 = scmp.ne.s32.totalorder %s55_s19, %s1558_s0  ;;  %p1564_p3 = scmp.lt.s32.totalorder %s1558_s0, %s1558_s0 }
  0x2a   :  { %p1565_p4 = por %p1564_p3, %p1563_p2 }
  0x2c   :  { %p1566_p5 = pnand %p1565_p4, %p1559_p1 }
  0x2e   :  { %1569 = shalt.err (!%p1566_p5)
}
  0x2f   :  { %60 = dma.hbm_to_vmem [thread:$0]  %s2211_s3, 512, %s55_s19, [#allocation9], %s1579_s1, %s1579_s1, %s1580_s15  }
  0x30   :  { %1570 = dma.done.wait [#allocation4], 256  }
  0x31   :  { %1571 = vsyncadd [#allocation4], 4294967040 }
  0x32   :  { %1572 = dma.done.wait [#allocation6], 2816  }
  0x33   :  { %1573 = vsyncadd [#allocation6], 4294964480 }
  0x34   :  { %1574 = dma.done.wait [#allocation9], 512  }
  0x35   :  { %1575 = vsyncadd [#allocation9], 4294966784  ;;  %v1582_v1 = vmov 0.0   ;;  %vm1583_vm0 = vmmov 0   ;;  %vm107_vm1 = vcmask 261120   ;;  %v106_v2 = vld [vmem:[#allocation8 + $0x18] sm:$0xff] }
  0x36   :  { %1410 = vmatprep.subr.mxu0 %v1582_v1  ;;  %1421 = vmatprep.subr.mxu1 %v1582_v1  ;;  %v105_v3 = vld [vmem:[#allocation8 + $0x10] sm:$0xff]  ;;  %v104_v4 = vld [vmem:[#allocation8 + $0x8] sm:$0xff]  ;;  %v1645_v5 = vand.u32 4294901760, %v106_v2  ;;  %v103_v8 = vld [vmem:[#allocation8] sm:$0xff]  ;;  %vm596_vm2 = vcmask 326656   ;;  %vm1327_vm3 = vcmask 64512  }
  0x37   :  { %1418 = vmatprep.mubr.msk.f32.mxu0 %vm1583_vm0, %v1582_v1  ;;  %1429 = vmatprep.mubr.msk.f32.mxu1 %vm1583_vm0, %v1582_v1  ;;  %v1647_v6 = vand.u32 4294901760, %v105_v3  ;;  %v1649_v7 = vand.u32 4294901760, %v104_v4  ;;  %v81_v9 = vld [vmem:[#allocation5] sm:$0xff]  ;;  %v1651_v10 = vand.u32 4294901760, %v103_v8  ;;  %v96_v34 = vld [vmem:[#allocation7 + $0x70] sm:$0xff]  ;;  %v95_v36 = vld [vmem:[#allocation7 + $0x68] sm:$0xff] }
  0x38   :  { %v109_v11 = vsel %vm107_vm1, %v81_v9, 0  ;;  %1411 = vmatpush3.msra.mxu0 %v1645_v5  ;;  %v216_v12 = vsub.f32 %v106_v2, %v1645_v5  ;;  %v97_v33 = vld [vmem:[#allocation7 + $0x78] sm:$0xff]  ;;  %v1700_v37 = vand.u32 4294901760, %v96_v34  ;;  %v1705_v38 = vand.u32 4294901760, %v95_v36  ;;  %v94_v39 = vld [vmem:[#allocation7 + $0x60] sm:$0xff]  ;;  %v92_v45 = vld [vmem:[#allocation7 + $0x50] sm:$0xff] }
  0x39   :  { %v1655_v13 = vand.u32 4294901760, %v109_v11  ;;  %v223_v14 = vsub.f32 %v105_v3, %v1647_v6  ;;  %v1659_v15 = vsub.f32 %v104_v4, %v1649_v7  ;;  %1412 = vmatprep.subr.mxu0 %v1582_v1  ;;  %v1663_v16 = vsub.f32 %v103_v8, %v1651_v10  ;;  %v93_v42 = vld [vmem:[#allocation7 + $0x58] sm:$0xff]  ;;  %v91_v49 = vld [vmem:[#allocation7 + $0x48] sm:$0xff]  ;;  %v90_v53 = vld [vmem:[#allocation7 + $0x40] sm:$0xff] }
  0x3a   :  { %1413 = vmatpush3.msra.mxu0 %v1647_v6  ;;  %v217_v17 = vand.u32 4294901760, %v216_v12  ;;  %v1696_v35 = vand.u32 4294901760, %v97_v33  ;;  %v1714_v41 = vsub.f32 %v96_v34, %v1700_v37  ;;  %v1717_v43 = vand.u32 4294901760, %v94_v39  ;;  %v89_v58 = vld [vmem:[#allocation7 + $0x38] sm:$0xff]  ;;  %v88_v63 = vld [vmem:[#allocation7 + $0x30] sm:$0xff] }
  0x3b   :  { %v1667_v18 = vsub.f32 %v109_v11, %v1655_v13  ;;  %v224_v19 = vand.u32 4294901760, %v223_v14  ;;  %v231_v20 = vand.u32 4294901760, %v1659_v15  ;;  %1414 = vmatprep.subr.mxu0 %v1582_v1  ;;  %v238_v21 = vand.u32 4294901760, %v1663_v16  ;;  %v86_v11 = vld [vmem:[#allocation7 + $0x20] sm:$0xff] }
  0x3c   :  { %1415 = vmatpush3.msra.mxu0 %v1649_v7  ;;  %v218_v22 = vsub.f32 %v216_v12, %v217_v17  ;;  %v1709_v40 = vsub.f32 %v97_v33, %v1696_v35  ;;  %v1723_v44 = vsub.f32 %v95_v36, %v1705_v38  ;;  %v1728_v47 = vand.u32 4294901760, %v93_v42 }
  0x3d   :  { %v182_v23 = vand.u32 4294901760, %v1667_v18  ;;  %v225_v24 = vsub.f32 %v223_v14, %v224_v19  ;;  %v232_v25 = vsub.f32 %v1659_v15, %v231_v20  ;;  %1416 = vmatprep.subr.mxu0 %v1582_v1  ;;  %v239_v29 = vsub.f32 %v1663_v16, %v238_v21 }
  0x3e   :  { %1417 = vmatpush3.msra.mxu0 %v1651_v10  ;;  %v219_v26 = vand.u32 4294901760, %v218_v22  ;;  %v704_v46 = vand.u32 4294901760, %v1709_v40  ;;  %v711_v48 = vand.u32 4294901760, %v1714_v41  ;;  %v1737_v50 = vsub.f32 %v94_v39, %v1717_v43  ;;  %v82_v39 = vld [vmem:[#allocation7] sm:$0xff] }
  0x3f   :  { %v183_v27 = vsub.f32 %v1667_v18, %v182_v23  ;;  %v226_v28 = vand.u32 4294901760, %v225_v24  ;;  %1432 = vmatprep.subr.mxu0 %v1582_v1  ;;  %v233_v31 = vand.u32 4294901760, %v232_v25  ;;  %v240_v32 = vand.u32 4294901760, %v239_v29 }
  0x40   :  { %1422 = vmatpush3.msra.mxu1 %v219_v26  ;;  %v1739_v51 = vand.u32 4294901760, %v92_v45  ;;  %v718_v52 = vand.u32 4294901760, %v1723_v44  ;;  %v705_v54 = vsub.f32 %v1709_v40, %v704_v46  ;;  %v1750_v55 = vsub.f32 %v93_v42, %v1728_v47  ;;  %v80_v42 = vld [vmem:[#allocation3 + $0x8] sm:$0xff] }
  0x41   :  { %v184_v30 = vand.u32 4294901760, %v183_v27  ;;  %1423 = vmatprep.subr.mxu1 %v1582_v1  ;;  %v1752_v56 = vand.u32 4294901760, %v91_v49  ;;  %v712_v57 = vsub.f32 %v1714_v41, %v711_v48  ;;  %v2229_v60 = vand.u32 4294901760, %v1737_v50 }
  0x42   :  { %1424 = vmatpush3.msra.mxu1 %v226_v28  ;;  %v1762_v59 = vsub.f32 %v92_v45, %v1739_v51  ;;  %v1765_v61 = vand.u32 4294901760, %v90_v53  ;;  %v719_v62 = vsub.f32 %v1723_v44, %v718_v52  ;;  %v706_v0 = vand.u32 4294901760, %v705_v54 }
  0x43   :  { %1419 = vmatmul.mubr.f32.vlgmr.msra.gmra.mxu0 %v184_v30  ;;  %1425 = vmatprep.subr.mxu1 %v1582_v1  ;;  %v1775_v2 = vsub.f32 %v91_v49, %v1752_v56  ;;  %v2228_v3 = vand.u32 4294901760, %v1750_v55  ;;  %v1778_v4 = vand.u32 4294901760, %v89_v58  ;;  %vm1367_vm4 = vcmask 7168  }
  0x44   :  { %1433 = vmatpush3.msra.mxu0 %v216_v12  ;;  %1426 = vmatpush3.msra.mxu1 %v233_v31  ;;  %v1789_v8 = vsub.f32 %v90_v53, %v1765_v61  ;;  %v2225_v9 = vand.u32 4294901760, %v1762_v59  ;;  %v720_v12 = vand.u32 4294901760, %v719_v62  ;;  %v83_v31 = vld [vmem:[#allocation7 + $0x8] sm:$0xff]  ;;  %v102_v62 = vld [vmem:[#allocation7 + $0xa0] sm:$0xff] }
  0x45   :  { %1434 = vmatprep.subr.mxu0 %v1582_v1  ;;  %1427 = vmatprep.subr.mxu1 %v1582_v1  ;;  %v1852_v54 = vand.u32 4294901760, %v83_v31 }
  0x46   :  { %1435 = vmatpush3.msra.mxu0 %v223_v14  ;;  %1428 = vmatpush3.msra.mxu1 %v240_v32  ;;  %v1801_v14 = vsub.f32 %v89_v58, %v1778_v4  ;;  %v2221_v22 = vand.u32 4294901760, %v1789_v8 }
  0x47   :  { %1436 = vmatprep.subr.mxu0 %v1582_v1  ;;  %1430 = vmatmul.mubr.f32.vlgmr.msra.gmra.mxu1 %v1655_v13 }
  0x48   :  { %1437 = vmatpush3.msra.mxu0 %v1659_v15  ;;  %1443 = vmatprep.subr.mxu1 %v1582_v1  ;;  %v2223_v15 = vand.u32 4294901760, %v1775_v2  ;;  %v2220_v28 = vand.u32 4294901760, %v1801_v14  ;;  %v754_v33 = vsub.f32 %v1789_v8, %v2221_v22 }
  0x49   :  { %1438 = vmatprep.subr.mxu0 %v1582_v1  ;;  %1440 = vmatprep.mubr.msk.f32.mxu0 %vm1583_vm0, %v1582_v1 }
  0x4a   :  { %1439 = vmatpush3.msra.mxu0 %v1663_v16  ;;  %1444 = vmatpush3.msra.mxu1 %v1645_v5  ;;  %v747_v26 = vsub.f32 %v1775_v2, %v2223_v15  ;;  %v761_v49 = vsub.f32 %v1801_v14, %v2220_v28 }
  0x4b   :  { %1454 = vmatprep.subr.mxu0 %v1582_v1  ;;  %1441 = vmatmul.mubr.f32.vlgmr.msra.gmra.mxu0 %v1667_v18  ;;  %v1808_v18 = vand.u32 4294901760, %v86_v11 }
  0x4c   :  { %1445 = vmatprep.subr.mxu1 %v1582_v1  ;;  %1455 = vmatpush3.msra.mxu0 %v217_v17  ;;  %v85_v17 = vld [vmem:[#allocation7 + $0x18] sm:$0xff]  ;;  %v748_v45 = vand.u32 4294901760, %v747_v26  ;;  %v100_v26 = vld [vmem:[#allocation7 + $0x90] sm:$0xff] }
  0x4d   :  { %1446 = vmatpush3.msra.mxu1 %v1647_v6  ;;  %1456 = vmatprep.subr.mxu0 %v1582_v1  ;;  %v1820_v24 = vand.u32 4294901760, %v85_v17  ;;  %v1833_v29 = vsub.f32 %v86_v11, %v1808_v18  ;;  %v101_v11 = vld [vmem:[#allocation7 + $0x98] sm:$0xff] }
  0x4e   :  { %1447 = vmatprep.subr.mxu1 %v1582_v1  ;;  %1457 = vmatpush3.msra.mxu0 %v224_v19 }
  0x4f   :  { %1448 = vmatpush3.msra.mxu1 %v1649_v7  ;;  %1458 = vmatprep.subr.mxu0 %v1582_v1  ;;  %v1845_v36 = vsub.f32 %v85_v17, %v1820_v24  ;;  %v2216_v58 = vand.u32 4294901760, %v1833_v29 }
  0x50   :  { %1449 = vmatprep.subr.mxu1 %v1582_v1  ;;  %1459 = vmatpush3.msra.mxu0 %v231_v20  ;;  %v740_v20 = vsub.f32 %v1762_v59, %v2225_v9 }
  0x51   :  { %1450 = vmatpush3.msra.mxu1 %v1651_v10  ;;  %1451 = vmatprep.mubr.msk.f32.mxu1 %vm1583_vm0, %v1582_v1 }
  0x52   :  { %1460 = vmatprep.subr.mxu0 %v1582_v1  ;;  %1452 = vmatmul.mubr.f32.vlgmr.msra.gmra.mxu1 %v182_v23  ;;  %v84_v23 = vld [vmem:[#allocation7 + $0x10] sm:$0xff]  ;;  %v741_v32 = vand.u32 4294901760, %v740_v20  ;;  %v1877_v20 = vand.u32 4294901760, %v102_v62 }
  0x53   :  { %1461 = vmatpush3.msra.mxu0 %v238_v21  ;;  %1465 = vmatprep.subr.mxu1 %v1582_v1  ;;  %v1835_v30 = vand.u32 4294901760, %v84_v23 }
  0x54   :  { %1462 = vmatprep.mubr.msk.f32.mxu0 %vm1583_vm0, %v1582_v1  ;;  %1466 = vmatpush3.msra.mxu1 %v1645_v5  ;;  %v713_v5 = vand.u32 4294901760, %v712_v57 }
  0x55   :  { %600 = vmatprep.subr.mxu0 %v1582_v1  ;;  %1463 = vmatmul.mubr.f32.vlgmr.msra.gmra.mxu0 %v1655_v13  ;;  %v1857_v57 = vsub.f32 %v84_v23, %v1835_v30  ;;  %v782_v23 = vsub.f32 %v1833_v29, %v2216_v58  ;;  %v99_v58 = vld [vmem:[#allocation7 + $0x88] sm:$0xff] }
  0x56   :  { %1467 = vmatprep.subr.mxu1 %v1582_v1  ;;  %602 = vmatpush1.msra.mxu0 %v1696_v35  ;;  %v1920_v22 = vand.u32 4294901760, %v99_v58 }
  0x57   :  { %1468 = vmatpush3.msra.mxu1 %v1647_v6  ;;  %603 = vmatprep.subr.mxu0 %v1582_v1  ;;  %v87_v6 = vld [vmem:[#allocation7 + $0x28] sm:$0xff] }
  0x58   :  { %1469 = vmatprep.subr.mxu1 %v1582_v1  ;;  %605 = vmatpush1.msra.mxu0 %v1700_v37  ;;  %v1804_v16 = vand.u32 4294901760, %v87_v6 }
  0x59   :  { %1470 = vmatpush3.msra.mxu1 %v1649_v7  ;;  %606 = vmatprep.subr.mxu0 %v1582_v1  ;;  %v726_v7 = vsub.f32 %v1737_v50, %v2229_v60 }
  0x5a   :  { %1471 = vmatprep.subr.mxu1 %v1582_v1  ;;  %608 = vmatpush1.msra.mxu0 %v1705_v38  ;;  %v1827_v27 = vsub.f32 %v87_v6, %v1804_v16  ;;  %v598_v6 = vsel %vm596_vm2, %v80_v42, 0  ;;  %v1891_v42 = vand.u32 4294901760, %v101_v11 }
  0x5b   :  { %1472 = vmatpush3.msra.mxu1 %v1651_v10  ;;  %1473 = vmatprep.mubr.msk.f32.mxu1 %vm1583_vm0, %v1582_v1  ;;  %v1792_v10 = vand.u32 4294901760, %v88_v63  ;;  %v727_v19 = vand.u32 4294901760, %v726_v7  ;;  %v2219_v7 = vand.u32 4294901760, %v1845_v36 }
  0x5c   :  { %609 = vmatprep.subr.mxu0 %v1582_v1  ;;  %1474 = vmatmul.mubr.f32.vlgmr.msra.gmra.mxu1 %v1655_v13  ;;  %v733_v13 = vsub.f32 %v1750_v55, %v2228_v3  ;;  %v2217_v53 = vand.u32 4294901760, %v1827_v27 }
  0x5d   :  { %611 = vmatpush1.msra.mxu0 %v1717_v43  ;;  %701 = vmatprep.subr.mxu1 %v1582_v1  ;;  %v1815_v21 = vsub.f32 %v88_v63, %v1792_v10  ;;  %v755_v63 = vand.u32 4294901760, %v754_v33 }
  0x5e   :  { %612 = vmatprep.subr.mxu0 %v1582_v1  ;;  %707 = vmatpush1.msra.mxu1 %v706_v0  ;;  %v734_v25 = vand.u32 4294901760, %v733_v13  ;;  %v762_v13 = vand.u32 4294901760, %v761_v49  ;;  %v775_v17 = vsub.f32 %v1827_v27, %v2217_v53  ;;  %v789_v49 = vsub.f32 %v1845_v36, %v2219_v7 }
  0x5f   :  { %614 = vmatpush1.msra.mxu0 %v1728_v47  ;;  %708 = vmatprep.subr.mxu1 %v1582_v1  ;;  %v2218_v34 = vand.u32 4294901760, %v1815_v21  ;;  %v1905_v53 = vand.u32 4294901760, %v100_v26 }
  0x60   :  { %615 = vmatprep.subr.mxu0 %v1582_v1  ;;  %714 = vmatpush1.msra.mxu1 %v713_v5  ;;  %v1864_v5 = vand.u32 4294901760, %v82_v39 }
  0x61   :  { %617 = vmatpush1.msra.mxu0 %v1739_v51  ;;  %715 = vmatprep.subr.mxu1 %v1582_v1  ;;  %v768_v0 = vsub.f32 %v1815_v21, %v2218_v34  ;;  %v783_v34 = vand.u32 4294901760, %v782_v23 }
  0x62   :  { %618 = vmatprep.subr.mxu0 %v1582_v1  ;;  %721 = vmatpush1.msra.mxu1 %v720_v12  ;;  %v79_v12 = vld [vmem:[#allocation3] sm:$0xff]  ;;  %v1889_v33 = vsub.f32 %v82_v39, %v1864_v5  ;;  %v1902_v39 = vsub.f32 %v102_v62, %v1877_v20  ;;  %v1917_v62 = vsub.f32 %v101_v11, %v1891_v42 }
  0x63   :  { %620 = vmatpush1.msra.mxu0 %v1752_v56  ;;  %722 = vmatprep.subr.mxu1 %v1582_v1  ;;  %v1932_v11 = vsub.f32 %v100_v26, %v1905_v53  ;;  %v1945_v26 = vsub.f32 %v99_v58, %v1920_v22 }
  0x64   :  { %621 = vmatprep.subr.mxu0 %v1582_v1  ;;  %728 = vmatpush1.msra.mxu1 %v727_v19  ;;  %v1875_v19 = vsub.f32 %v83_v31, %v1852_v54  ;;  %v769_v31 = vand.u32 4294901760, %v768_v0  ;;  %v2230_v9 = vand.u32 4294901760, %v1917_v62 }
  0x65   :  { %623 = vmatpush1.msra.mxu0 %v1765_v61  ;;  %729 = vmatprep.subr.mxu1 %v1582_v1  ;;  %v852_v58 = vand.u32 4294901760, %v1932_v11  ;;  %v859_v3 = vand.u32 4294901760, %v1945_v26 }
  0x66   :  { %624 = vmatprep.subr.mxu0 %v1582_v1  ;;  %735 = vmatpush1.msra.mxu1 %v734_v25  ;;  %v2222_v25 = vand.u32 4294901760, %v1857_v57  ;;  %v2224_v0 = vand.u32 4294901760, %v1875_v19 }
  0x67   :  { %626 = vmatpush1.msra.mxu0 %v1778_v4  ;;  %736 = vmatprep.subr.mxu1 %v1582_v1 }
  0x68   :  { %627 = vmatprep.subr.mxu0 %v1582_v1  ;;  %742 = vmatpush1.msra.mxu1 %v741_v32  ;;  %v1885_v32 = vand.u32 4294901760, %v598_v6  ;;  %v796_v7 = vsub.f32 %v1857_v57, %v2222_v25  ;;  %v790_v25 = vand.u32 4294901760, %v789_v49 }
  0x69   :  { %629 = vmatpush1.msra.mxu0 %v1792_v10  ;;  %743 = vmatprep.subr.mxu1 %v1582_v1 }
  0x6a   :  { %630 = vmatprep.subr.mxu0 %v1582_v1  ;;  %749 = vmatpush1.msra.mxu1 %v748_v45  ;;  %v1893_v45 = vand.u32 4294901760, %v79_v12  ;;  %v1913_v28 = vsub.f32 %v598_v6, %v1885_v32  ;;  %v803_v6 = vsub.f32 %v1875_v19, %v2224_v0 }
  0x6b   :  { %632 = vmatpush1.msra.mxu0 %v1804_v16  ;;  %750 = vmatprep.subr.mxu1 %v1582_v1 }
  0x6c   :  { %633 = vmatprep.subr.mxu0 %v1582_v1  ;;  %756 = vmatpush1.msra.mxu1 %v755_v63  ;;  %v776_v63 = vand.u32 4294901760, %v775_v17  ;;  %v2226_v17 = vand.u32 4294901760, %v1889_v33  ;;  %v1923_v23 = vsub.f32 %v79_v12, %v1893_v45  ;;  %v797_v12 = vand.u32 4294901760, %v796_v7 }
  0x6d   :  { %635 = vmatpush1.msra.mxu0 %v1808_v18  ;;  %757 = vmatprep.subr.mxu1 %v1582_v1  ;;  %v2232_v49 = vand.u32 4294901760, %v1913_v28 }
  0x6e   :  { %636 = vmatprep.subr.mxu0 %v1582_v1  ;;  %763 = vmatpush1.msra.mxu1 %v762_v13  ;;  %v98_v13 = vld [vmem:[#allocation7 + $0x80] sm:$0xff]  ;;  %v2231_v0 = vand.u32 4294901760, %v1923_v23 }
  0x6f   :  { %638 = vmatpush1.msra.mxu0 %v1820_v24  ;;  %764 = vmatprep.subr.mxu1 %v1582_v1  ;;  %v1935_v15 = vand.u32 4294901760, %v98_v13 }
  0x70   :  { %639 = vmatprep.subr.mxu0 %v1582_v1  ;;  %770 = vmatpush1.msra.mxu1 %v769_v31  ;;  %v2227_v31 = vand.u32 4294901760, %v1902_v39 }
  0x71   :  { %641 = vmatpush1.msra.mxu0 %v1835_v30  ;;  %771 = vmatprep.subr.mxu1 %v1582_v1 }
  0x72   :  { %642 = vmatprep.subr.mxu0 %v1582_v1  ;;  %777 = vmatpush1.msra.mxu1 %v776_v63  ;;  %v810_v63 = vsub.f32 %v1889_v33, %v2226_v17  ;;  %v839_v7 = vsub.f32 %v1902_v39, %v2227_v31  ;;  %v1956_v17 = vsub.f32 %v98_v13, %v1935_v15 }
  0x73   :  { %644 = vmatpush1.msra.mxu0 %v1852_v54  ;;  %778 = vmatprep.subr.mxu1 %v1582_v1  ;;  %v694_v31 = vsub.f32 %v1923_v23, %v2231_v0  ;;  %v846_v13 = vsub.f32 %v1917_v62, %v2230_v9 }
  0x74   :  { %645 = vmatprep.subr.mxu0 %v1582_v1  ;;  %784 = vmatpush1.msra.mxu1 %v783_v34  ;;  %v804_v34 = vand.u32 4294901760, %v803_v6  ;;  %v811_v6 = vand.u32 4294901760, %v810_v63  ;;  %v853_v63 = vsub.f32 %v1932_v11, %v852_v58  ;;  %v866_v60 = vand.u32 4294901760, %v1956_v17 }
  0x75   :  { %647 = vmatpush1.msra.mxu0 %v1864_v5  ;;  %785 = vmatprep.subr.mxu1 %v1582_v1  ;;  %v695_v0 = vand.u32 4294901760, %v694_v31 }
  0x76   :  { %670 = vmatprep.subr.mxu0 %v1582_v1  ;;  %791 = vmatpush1.msra.mxu1 %v790_v25  ;;  %v688_v25 = vsub.f32 %v1913_v28, %v2232_v49  ;;  %v847_v49 = vand.u32 4294901760, %v846_v13 }
  0x77   :  { %672 = vmatpush2.msra.mxu0 %v1877_v20  ;;  %792 = vmatprep.subr.mxu1 %v1582_v1 }
  0x78   :  { %673 = vmatprep.subr.mxu0 %v1582_v1  ;;  %798 = vmatpush1.msra.mxu1 %v797_v12  ;;  %v840_v12 = vand.u32 4294901760, %v839_v7  ;;  %v689_v9 = vand.u32 4294901760, %v688_v25  ;;  %v854_v7 = vand.u32 4294901760, %v853_v63  ;;  %v867_v25 = vsub.f32 %v1956_v17, %v866_v60 }
  0x79   :  { %675 = vmatpush2.msra.mxu0 %v1891_v42  ;;  %799 = vmatprep.subr.mxu1 %v1582_v1 }
  0x7a   :  { %676 = vmatprep.subr.mxu0 %v1582_v1  ;;  %805 = vmatpush1.msra.mxu1 %v804_v34  ;;  %v860_v34 = vsub.f32 %v1945_v26, %v859_v3 }
  0x7b   :  { %678 = vmatpush2.msra.mxu0 %v1905_v53  ;;  %806 = vmatprep.subr.mxu1 %v1582_v1 }
  0x7c   :  { %679 = vmatprep.subr.mxu0 %v1582_v1  ;;  %812 = vmatpush1.msra.mxu1 %v811_v6  ;;  %v861_v31 = vand.u32 4294901760, %v860_v34  ;;  %v868_v6 = vand.u32 4294901760, %v867_v25 }
  0x7d   :  { %681 = vmatpush2.msra.mxu0 %v1920_v22  ;;  %835 = vmatprep.subr.mxu1 %v1582_v1 }
  0x7e   :  { %682 = vmatprep.subr.mxu0 %v1582_v1  ;;  %841 = vmatpush2.msra.mxu1 %v840_v12 }
  0x7f   :  { %684 = vmatpush2.msra.mxu0 %v1935_v15  ;;  %690 = vmatprep.mubr.f32.mxu0 %v689_v9 }
  0x80   :  { %842 = vmatprep.subr.mxu1 %v1582_v1  ;;  %696 = vmatmul.mubr.f32.vlgmr.msra.gmra.mxu0 %v695_v0 }
  0x81   :  { %848 = vmatpush2.msra.mxu1 %v847_v49  ;;  %878 = vmatprep.subr.mxu0 %v1582_v1 }
  0x82   :  { %849 = vmatprep.subr.mxu1 %v1582_v1  ;;  %881 = vmatpush1.msra.mxu0 %v1709_v40  ;;  %v2233_v40 = vand.u32 4294901760, %v1913_v28 }
  0x83   :  { %855 = vmatpush2.msra.mxu1 %v854_v7  ;;  %882 = vmatprep.subr.mxu0 %v1582_v1 }
  0x84   :  { %856 = vmatprep.subr.mxu1 %v1582_v1  ;;  %885 = vmatpush1.msra.mxu0 %v1714_v41  ;;  %v2235_v41 = vand.u32 4294901760, %v1737_v50 }
  0x85   :  { %862 = vmatpush2.msra.mxu1 %v861_v31  ;;  %886 = vmatprep.subr.mxu0 %v1582_v1 }
  0x86   :  { %863 = vmatprep.subr.mxu1 %v1582_v1  ;;  %889 = vmatpush1.msra.mxu0 %v1723_v44  ;;  %v2236_v44 = vand.u32 4294901760, %v1750_v55 }
  0x87   :  { %869 = vmatpush2.msra.mxu1 %v868_v6  ;;  %871 = vmatprep.mubr.f32.mxu1 %v1885_v32 }
  0x88   :  { %890 = vmatprep.subr.mxu0 %v1582_v1  ;;  %873 = vmatmul.mubr.f32.vlgmr.msra.gmra.mxu1 %v1893_v45 }
  0x89   :  { %893 = vmatpush1.msra.mxu0 %v1737_v50  ;;  %994 = vmatprep.subr.mxu1 %v1582_v1  ;;  %v2243_v50 = vand.u32 4294901760, %v1833_v29 }
  0x8a   :  { %894 = vmatprep.subr.mxu0 %v1582_v1  ;;  %996 = vmatpush1.msra.mxu1 %v1696_v35 }
  0x8b   :  { %897 = vmatpush1.msra.mxu0 %v1750_v55  ;;  %997 = vmatprep.subr.mxu1 %v1582_v1  ;;  %v2246_v55 = vand.u32 4294901760, %v1875_v19 }
  0x8c   :  { %898 = vmatprep.subr.mxu0 %v1582_v1  ;;  %999 = vmatpush1.msra.mxu1 %v1700_v37 }
  0x8d   :  { %901 = vmatpush1.msra.mxu0 %v1762_v59  ;;  %1000 = vmatprep.subr.mxu1 %v1582_v1 }
  0x8e   :  { %902 = vmatprep.subr.mxu0 %v1582_v1  ;;  %1002 = vmatpush1.msra.mxu1 %v1705_v38 }
  0x8f   :  { %905 = vmatpush1.msra.mxu0 %v1775_v2  ;;  %1003 = vmatprep.subr.mxu1 %v1582_v1 }
  0x90   :  { %906 = vmatprep.subr.mxu0 %v1582_v1  ;;  %1005 = vmatpush1.msra.mxu1 %v1717_v43 }
  0x91   :  { %909 = vmatpush1.msra.mxu0 %v1789_v8  ;;  %1006 = vmatprep.subr.mxu1 %v1582_v1 }
  0x92   :  { %910 = vmatprep.subr.mxu0 %v1582_v1  ;;  %1008 = vmatpush1.msra.mxu1 %v1728_v47 }
  0x93   :  { %913 = vmatpush1.msra.mxu0 %v1801_v14  ;;  %1009 = vmatprep.subr.mxu1 %v1582_v1 }
  0x94   :  { %914 = vmatprep.subr.mxu0 %v1582_v1  ;;  %1011 = vmatpush1.msra.mxu1 %v1739_v51 }
  0x95   :  { %917 = vmatpush1.msra.mxu0 %v1815_v21  ;;  %1012 = vmatprep.subr.mxu1 %v1582_v1 }
  0x96   :  { %918 = vmatprep.subr.mxu0 %v1582_v1  ;;  %1014 = vmatpush1.msra.mxu1 %v1752_v56 }
  0x97   :  { %921 = vmatpush1.msra.mxu0 %v1827_v27  ;;  %1015 = vmatprep.subr.mxu1 %v1582_v1 }
  0x98   :  { %922 = vmatprep.subr.mxu0 %v1582_v1  ;;  %1017 = vmatpush1.msra.mxu1 %v1765_v61 }
  0x99   :  { %925 = vmatpush1.msra.mxu0 %v1833_v29  ;;  %1018 = vmatprep.subr.mxu1 %v1582_v1 }
  0x9a   :  { %926 = vmatprep.subr.mxu0 %v1582_v1  ;;  %1020 = vmatpush1.msra.mxu1 %v1778_v4 }
  0x9b   :  { %929 = vmatpush1.msra.mxu0 %v1845_v36  ;;  %1021 = vmatprep.subr.mxu1 %v1582_v1 }
  0x9c   :  { %930 = vmatprep.subr.mxu0 %v1582_v1  ;;  %1023 = vmatpush1.msra.mxu1 %v1792_v10 }
  0x9d   :  { %933 = vmatpush1.msra.mxu0 %v1857_v57  ;;  %1024 = vmatprep.subr.mxu1 %v1582_v1 }
  0x9e   :  { %934 = vmatprep.subr.mxu0 %v1582_v1  ;;  %1026 = vmatpush1.msra.mxu1 %v1804_v16 }
  0x9f   :  { %937 = vmatpush1.msra.mxu0 %v1875_v19  ;;  %1027 = vmatprep.subr.mxu1 %v1582_v1 }
  0xa0   :  { %938 = vmatprep.subr.mxu0 %v1582_v1  ;;  %1029 = vmatpush1.msra.mxu1 %v1808_v18 }
  0xa1   :  { %941 = vmatpush1.msra.mxu0 %v1889_v33  ;;  %1030 = vmatprep.subr.mxu1 %v1582_v1 }
  0xa2   :  { %964 = vmatprep.subr.mxu0 %v1582_v1  ;;  %1032 = vmatpush1.msra.mxu1 %v1820_v24 }
  0xa3   :  { %967 = vmatpush2.msra.mxu0 %v1902_v39  ;;  %1033 = vmatprep.subr.mxu1 %v1582_v1 }
  0xa4   :  { %968 = vmatprep.subr.mxu0 %v1582_v1  ;;  %1035 = vmatpush1.msra.mxu1 %v1835_v30 }
  0xa5   :  { %971 = vmatpush2.msra.mxu0 %v1917_v62  ;;  %1036 = vmatprep.subr.mxu1 %v1582_v1 }
  0xa6   :  { %972 = vmatprep.subr.mxu0 %v1582_v1  ;;  %1038 = vmatpush1.msra.mxu1 %v1852_v54 }
  0xa7   :  { %975 = vmatpush2.msra.mxu0 %v1932_v11  ;;  %1039 = vmatprep.subr.mxu1 %v1582_v1 }
  0xa8   :  { %976 = vmatprep.subr.mxu0 %v1582_v1  ;;  %1041 = vmatpush1.msra.mxu1 %v1864_v5 }
  0xa9   :  { %979 = vmatpush2.msra.mxu0 %v1945_v26  ;;  %1064 = vmatprep.subr.mxu1 %v1582_v1 }
  0xaa   :  { %980 = vmatprep.subr.mxu0 %v1582_v1  ;;  %1066 = vmatpush2.msra.mxu1 %v1877_v20 }
  0xab   :  { %983 = vmatpush2.msra.mxu0 %v1956_v17  ;;  %986 = vmatprep.mubr.f32.mxu0 %v1913_v28  ;;  %v1376_v17 = vld [vmem:[%s2212_s4] ss:$0 sm:$0xff] }
  0xac   :  { %1067 = vmatprep.subr.mxu1 %v1582_v1  ;;  %989 = vmatmul.mubr.f32.vlgmr.msra.gmra.mxu0 %v1923_v23 }
  0xad   :  { %1069 = vmatpush2.msra.mxu1 %v1891_v42  ;;  %1091 = vmatprep.subr.mxu0 %v1582_v1 }
  0xae   :  { %1070 = vmatprep.subr.mxu1 %v1582_v1  ;;  %1095 = vmatpush1.msra.mxu0 %v704_v46  ;;  %v2234_v46 = vand.u32 4294901760, %v1923_v23 }
  0xaf   :  { %1072 = vmatpush2.msra.mxu1 %v1905_v53  ;;  %1096 = vmatprep.subr.mxu0 %v1582_v1 }
  0xb0   :  { %1073 = vmatprep.subr.mxu1 %v1582_v1  ;;  %1100 = vmatpush1.msra.mxu0 %v711_v48  ;;  %v2237_v48 = vand.u32 4294901760, %v1762_v59  ;;  %v2248_v59 = vand.u32 4294901760, %v1902_v39 }
  0xb1   :  { %1075 = vmatpush2.msra.mxu1 %v1920_v22  ;;  %1101 = vmatprep.subr.mxu0 %v1582_v1 }
  0xb2   :  { %1076 = vmatprep.subr.mxu1 %v1582_v1  ;;  %1105 = vmatpush1.msra.mxu0 %v718_v52  ;;  %v2245_v52 = vand.u32 4294901760, %v1857_v57 }
  0xb3   :  { %1078 = vmatpush2.msra.mxu1 %v1935_v15  ;;  %1082 = vmatprep.mubr.f32.mxu1 %v2233_v40  ;;  %v1377_v40 = vld [vmem:[%s2213_s5] ss:$0 sm:$0xff] }
  0xb4   :  { %1106 = vmatprep.subr.mxu0 %v1582_v1  ;;  %1086 = vmatmul.mubr.f32.vlgmr.msra.gmra.mxu1 %v2234_v46 }
  0xb5   :  { %1110 = vmatpush1.msra.mxu0 %v2235_v41  ;;  %1226 = vmatprep.subr.mxu1 %v1582_v1 }
  0xb6   :  { %1111 = vmatprep.subr.mxu0 %v1582_v1  ;;  %1228 = vmatpush1.msra.mxu1 %v1696_v35  ;;  %v2238_v35 = vand.u32 4294901760, %v1775_v2 }
  0xb7   :  { %1115 = vmatpush1.msra.mxu0 %v2236_v44  ;;  %1229 = vmatprep.subr.mxu1 %v1582_v1 }
  0xb8   :  { %1116 = vmatprep.subr.mxu0 %v1582_v1  ;;  %1231 = vmatpush1.msra.mxu1 %v1700_v37  ;;  %v2239_v37 = vand.u32 4294901760, %v1789_v8 }
  0xb9   :  { %1120 = vmatpush1.msra.mxu0 %v2237_v48  ;;  %1232 = vmatprep.subr.mxu1 %v1582_v1  ;;  %v1378_v48 = vld [vmem:[#allocation2] ss:$0 sm:$0xff] }
  0xba   :  { %1121 = vmatprep.subr.mxu0 %v1582_v1  ;;  %1234 = vmatpush1.msra.mxu1 %v1705_v38  ;;  %v2240_v38 = vand.u32 4294901760, %v1801_v14 }
  0xbb   :  { %1125 = vmatpush1.msra.mxu0 %v2238_v35  ;;  %1235 = vmatprep.subr.mxu1 %v1582_v1 }
  0xbc   :  { %1126 = vmatprep.subr.mxu0 %v1582_v1  ;;  %1237 = vmatpush1.msra.mxu1 %v1717_v43  ;;  %v2241_v43 = vand.u32 4294901760, %v1815_v21 }
  0xbd   :  { %1130 = vmatpush1.msra.mxu0 %v2239_v37  ;;  %1238 = vmatprep.subr.mxu1 %v1582_v1 }
  0xbe   :  { %1131 = vmatprep.subr.mxu0 %v1582_v1  ;;  %1240 = vmatpush1.msra.mxu1 %v1728_v47  ;;  %v2242_v47 = vand.u32 4294901760, %v1827_v27 }
  0xbf   :  { %1135 = vmatpush1.msra.mxu0 %v2240_v38  ;;  %1241 = vmatprep.subr.mxu1 %v1582_v1 }
  0xc0   :  { %1136 = vmatprep.subr.mxu0 %v1582_v1  ;;  %1243 = vmatpush1.msra.mxu1 %v1739_v51  ;;  %v2244_v51 = vand.u32 4294901760, %v1845_v36 }
  0xc1   :  { %1140 = vmatpush1.msra.mxu0 %v2241_v43  ;;  %1244 = vmatprep.subr.mxu1 %v1582_v1 }
  0xc2   :  { %1141 = vmatprep.subr.mxu0 %v1582_v1  ;;  %1246 = vmatpush1.msra.mxu1 %v1752_v56  ;;  %v2247_v56 = vand.u32 4294901760, %v1889_v33 }
  0xc3   :  { %1145 = vmatpush1.msra.mxu0 %v2242_v47  ;;  %1247 = vmatprep.subr.mxu1 %v1582_v1 }
  0xc4   :  { %1146 = vmatprep.subr.mxu0 %v1582_v1  ;;  %1249 = vmatpush1.msra.mxu1 %v1765_v61  ;;  %v2249_v61 = vand.u32 4294901760, %v1917_v62 }
  0xc5   :  { %1150 = vmatpush1.msra.mxu0 %v2243_v50  ;;  %1250 = vmatprep.subr.mxu1 %v1582_v1 }
  0xc6   :  { %1151 = vmatprep.subr.mxu0 %v1582_v1  ;;  %1252 = vmatpush1.msra.mxu1 %v1778_v4 }
  0xc7   :  { %1155 = vmatpush1.msra.mxu0 %v2244_v51  ;;  %1253 = vmatprep.subr.mxu1 %v1582_v1 }
  0xc8   :  { %1156 = vmatprep.subr.mxu0 %v1582_v1  ;;  %1255 = vmatpush1.msra.mxu1 %v1792_v10 }
  0xc9   :  { %1160 = vmatpush1.msra.mxu0 %v2245_v52  ;;  %1256 = vmatprep.subr.mxu1 %v1582_v1 }
  0xca   :  { %1161 = vmatprep.subr.mxu0 %v1582_v1  ;;  %1258 = vmatpush1.msra.mxu1 %v1804_v16 }
  0xcb   :  { %1165 = vmatpush1.msra.mxu0 %v2246_v55  ;;  %1259 = vmatprep.subr.mxu1 %v1582_v1 }
  0xcc   :  { %1166 = vmatprep.subr.mxu0 %v1582_v1  ;;  %1261 = vmatpush1.msra.mxu1 %v1808_v18 }
  0xcd   :  { %1170 = vmatpush1.msra.mxu0 %v2247_v56  ;;  %1262 = vmatprep.subr.mxu1 %v1582_v1 }
  0xce   :  { %1193 = vmatprep.subr.mxu0 %v1582_v1  ;;  %1264 = vmatpush1.msra.mxu1 %v1820_v24 }
  0xcf   :  { %1197 = vmatpush2.msra.mxu0 %v2248_v59  ;;  %1265 = vmatprep.subr.mxu1 %v1582_v1 }
  0xd0   :  { %1198 = vmatprep.subr.mxu0 %v1582_v1  ;;  %1267 = vmatpush1.msra.mxu1 %v1835_v30 }
  0xd1   :  { %1202 = vmatpush2.msra.mxu0 %v2249_v61  ;;  %1268 = vmatprep.subr.mxu1 %v1582_v1 }
  0xd2   :  { %1203 = vmatprep.subr.mxu0 %v1582_v1  ;;  %1270 = vmatpush1.msra.mxu1 %v1852_v54 }
  0xd3   :  { %1207 = vmatpush2.msra.mxu0 %v852_v58  ;;  %1271 = vmatprep.subr.mxu1 %v1582_v1 }
  0xd4   :  { %1208 = vmatprep.subr.mxu0 %v1582_v1  ;;  %1273 = vmatpush1.msra.mxu1 %v1864_v5 }
  0xd5   :  { %1212 = vmatpush2.msra.mxu0 %v859_v3  ;;  %1296 = vmatprep.subr.mxu1 %v1582_v1 }
  0xd6   :  { %1213 = vmatprep.subr.mxu0 %v1582_v1  ;;  %1298 = vmatpush2.msra.mxu1 %v1877_v20 }
  0xd7   :  { %1217 = vmatpush2.msra.mxu0 %v866_v60  ;;  %1219 = vmatprep.mubr.f32.mxu0 %v1885_v32 }
  0xd8   :  { %1299 = vmatprep.subr.mxu1 %v1582_v1  ;;  %1221 = vmatmul.mubr.f32.vlgmr.msra.gmra.mxu0 %v1893_v45 }
  0xd9   :  { %1301 = vmatpush2.msra.mxu1 %v1891_v42  ;;  %1312 = vmatprep.mubr.f32.mxu1 %v1885_v32 }
  0xda   :  { %1302 = vmatprep.subr.mxu1 %v1582_v1 }
  0xdb   :  { %1304 = vmatpush2.msra.mxu1 %v1905_v53 }
  0xdc   :  { %1305 = vmatprep.subr.mxu1 %v1582_v1 }
  0xdd   :  { %1307 = vmatpush2.msra.mxu1 %v1920_v22 }
  0xde   :  { %1308 = vmatprep.subr.mxu1 %v1582_v1 }
  0xdf   :  { %1310 = vmatpush2.msra.mxu1 %v1935_v15 }
  0xe0   :  { %1314 = vmatmul.mubr.f32.vlgmr.msra.gmra.mxu1 %v1893_v45 }
 0x103   :  { %v186_v60 = vpop.f32.mrf.mxu0 }
 0x105   :  { %v1420_v2 = vpop.f32.mrf.mxu0 }
 0x107   :  { %v277_v3 = vpop.f32.mrf.mxu1 }
 0x108   :  { %v278_v4 = vadd.f32 %v277_v3, %v186_v60 }
 0x109   :  { %v1431_v8 = vpop.f32.mrf.mxu1 }
 0x10b   :  { %v357_v9 = vpop.f32.mrf.mxu0 }
 0x10c   :  { %v358_v10 = vadd.f32 %v357_v9, %v278_v4 }
 0x10d   :  { %v1442_v14 = vpop.f32.mrf.mxu0 }
 0x112   :  { %v434_v16 = vpop.f32.mrf.mxu1 }
 0x113   :  { %v435_v18 = vadd.f32 %v434_v16, %v358_v10 }
 0x114   :  { %v1453_v21 = vpop.f32.mrf.mxu1 }
 0x115   :  { %v517_v24 = vpop.f32.mrf.mxu0 }
 0x116   :  { %v518_v27 = vadd.f32 %v517_v24, %v435_v18 }
 0x117   :  { %v1464_v22 = vpop.f32.mrf.mxu0 }
 0x11c   :  { %v592_v28 = vpop.f32.mrf.mxu1 }
 0x11d   :  { %v593_v1 = vadd.f32 %v592_v28, %v518_v27 }
 0x11e   :  { %v1475_v29 = vpop.f32.mrf.mxu1 }
 0x140   :  { %v697_v15 = vpop.f32.mrf.mxu0 }
 0x141   :  { %v698_v30 = vadd.f32 %v697_v15, %v593_v1 }
 0x142   :  { %v699_v36 = vpop.f32.mrf.mxu0 }
 0x148   :  { %v874_v53 = vpop.f32.mrf.mxu1 }
 0x149   :  { %v875_v54 = vadd.f32 %v874_v53, %v698_v30 }
 0x14a   :  { %v876_v57 = vpop.f32.mrf.mxu1 }
 0x16c   :  { %v990_v5 = vpop.f32.mrf.mxu0 }
 0x16d   :  { %v991_v42 = vadd.f32 %v990_v5, %v875_v54 }
 0x16e   :  { %v992_v19 = vpop.f32.mrf.mxu0 }
 0x174   :  { %v1087_v20 = vpop.f32.mrf.mxu1 }
 0x175   :  { %v1088_v39 = vadd.f32 %v1087_v20, %v991_v42 }
 0x176   :  { %v1089_v32 = vpop.f32.mrf.mxu1 }
 0x198   :  { %v1222_v33 = vpop.f32.mrf.mxu0 }
 0x199   :  { %v1223_v0 = vadd.f32 %v1222_v33, %v1088_v39 }
 0x19a   :  { %v1224_v45 = vpop.f32.mrf.mxu0 }
 0x1a0   :  { %v1315_v62 = vpop.f32.mrf.mxu1 }
 0x1a1   :  { %v1316_v23 = vadd.f32 %v1315_v62, %v1223_v0 }
 0x1a2   :  { %v1317_v11 = vpop.f32.mrf.mxu1 }
 0x1a3   :  { %v1326_v49 = vadd.f32 %v1376_v17, %v1316_v23 }
 0x1a5   :  { %v1328_v26 = vsel %vm1327_vm3, %v1326_v49, 0.0 }
 0x1a6   :  { %1329 = vadd.xlane.f32.xlu0 %v1328_v26 }
 0x22f   :  { %v1330_v58 = vpop.xlane.xlu0 %1329 }
 0x230   :  { %v1332_v13 = vmul.f32 0.125, %v1330_v58 }
 0x232   :  { %v1333_v12 = vsub.f32 %v1326_v49, %v1332_v13 }
 0x234   :  { %v1334_v63 = vmul.f32 %v1333_v12, %v1333_v12 }
 0x236   :  { %v1335_v34 = vsel %vm1327_vm3, %v1334_v63, 0.0 }
 0x237   :  { %1336 = vadd.xlane.f32.xlu0 %v1335_v34 }
 0x2c0   :  { %v1337_v7 = vpop.xlane.xlu0 %1336 }
 0x2c1   :  { %v1338_v25 = vmul.f32 0.125, %v1337_v7 }
 0x2c3   :  { %v1339_v31 = vadd.f32 1e-05, %v1338_v25 }
 0x2c5   :  { %1484 = vrsqrt.f32 %v1339_v31 }
 0x2d2   :  { %v1485_v6 = vpop.eup %1484 }
 0x2d3   :  { %v1341_v46 = vmul.f32 %v1485_v6, %v1333_v12 }
 0x2d5   :  { %v1349_v41 = vmul.f32 %v1377_v40, %v1341_v46 }
 0x2d7   :  { %v1350_v44 = vsel %vm1327_vm3, %v1349_v41, 0.0 }
 0x2d8   :  { %1351 = vadd.xlane.f32.xlu1 %v1350_v44 }
 0x361   :  { %v1352_v35 = vpop.xlane.xlu1 %1351 }
 0x362   :  { %v1360_v37 = vadd.f32 %v1378_v48, %v1352_v35 }
 0x364   :  { %v1379_v38 = vmul.f32 -1.442695, %v1360_v37 }
 0x366   :  { %1486 = vpow2.f32 %v1379_v38 }
 0x373   :  { %v1487_v43 = vpop.eup %1486 }
 0x374   :  { %v1364_v47 = vadd.f32 1.0, %v1487_v43 }
 0x376   :  { %1488 = vrcp.f32 %v1364_v47 }
 0x383   :  { %v1489_v50 = vpop.eup %1488 }
 0x384   :  { %1368 = vst.msk [vmem:[%s2215_s7] sm:$0xff] %vm1367_vm4, %v1489_v50 }
 0x385   :  { %1373 = vsyncpa [#allocation4], 1 }
 0x386   :  { %1374 = vsyncpa [#allocation6], 1 }
 0x387   :  { %1375 = vsyncpa [#allocation9], 1 }

</bundles_post_ra>
